<compile_context>
chip_gen: v7x
topology: tpu7x:2x2x1
jax: 0.10.0
libtpu: 0.0.40
codegen_flags: <defaults>
</compile_context>

<pallas_src>
import functools

import jax
import jax.numpy as jnp
from jax.experimental import pallas as pl
from jax.experimental.pallas import tpu as pltpu

LANE = 128


def _round_up(x, m):
    return (x + m - 1) // m * m


def _sublane_pack(itemsize):
    # Dense vreg packing: 8 sublane rows for 32-bit, 16 for 16-bit, 32 for 8-bit.
    return {4: 8, 2: 16, 1: 32}.get(itemsize, 8)


def _vmem_capacity_bytes():
    """Per-core VMEM capacity; conservative 64 MiB (v7x) fallback."""
    try:
        info = pltpu.get_tpu_info()
        cap = getattr(info, "vmem_capacity_bytes", None)
        if cap:
            return int(cap)
    except Exception:
        pass
    return 64 * 1024 * 1024


def _vmem_block_bytes(shape, itemsize):
    """Approx VMEM footprint of one block: last dim padded to 128 lanes,
    second-to-last to the dtype's sublane pack, leading dims as-is."""
    pack = _sublane_pack(itemsize)
    if len(shape) == 0:
        return itemsize
    if len(shape) == 1:
        return _round_up(shape[0], LANE) * itemsize
    lead = 1
    for d in shape[:-2]:
        lead *= d
    return lead * _round_up(shape[-2], pack) * _round_up(shape[-1], LANE) * itemsize


def _choose_batch_tile(B):
    if B >= 256:
        TB = 256                       # match 256-wide MXU M dim, fewer steps
    elif B > 128:
        TB = 128
    else:
        TB = B                         # full dim => always a legal block dim
    # v7x: make sure the leading 'parallel' grid axis has >= 2 entries so both
    # TensorCores get work.  Only when the halves stay multiples of 8 (block
    # second-to-last dim constraint).  Harmless on single-TC v5e/v6e.
    if pl.cdiv(B, TB) == 1 and B >= 16 and B % 16 == 0:
        TB = B // 2
    return TB


def _choose_seq_tile(S, TB, E, itemsize, per_buffer_bytes):
    """Largest seq tile whose lane/sublane-padded VMEM block fits the budget.

    Tiles are multiples of the dtype's sublane pack (8 for f32, 16 for bf16)
    or the full S.  Prefers divisors of S (no tail masking); otherwise the
    kernel masks the ragged last tile.
    """
    pack = _sublane_pack(itemsize)
    e_lanes = _round_up(E, LANE)                 # lane-padded footprint per row
    row_bytes = TB * e_lanes * itemsize
    max_ts = (per_buffer_bytes // (row_bytes * pack)) * pack
    if max_ts >= S:
        return S
    if max_ts < pack:
        return min(S, pack)                      # floor; vmem_limit headroom covers it
    best_div = 0
    for ts in range(max_ts, pack - 1, -pack):
        if S % ts == 0:
            best_div = ts
            break
    # Only give up block size for exact divisibility if the loss is small.
    if best_div >= (3 * max_ts) // 4:
        return best_div
    return max_ts


def baseline_kernel(x_ref, len_ref, w1_ref, b1_ref, w2_ref, b2_ref,
                    w3_ref, b3_ref, o_ref, acc_ref, *, seq_len, seq_tile):
    s = pl.program_id(1)

    # ---- init accumulator at the first seq tile ----
    @pl.when(s == 0)
    def _init():
        acc_ref[...] = jnp.zeros_like(acc_ref)

    # ---- MeanPoolingLayer (sum part): accumulate seq-sum in f32 ----
    # (upcast so bf16-streamed x is still accumulated at full precision)
    x = x_ref[...].astype(jnp.float32)
    if seq_len % seq_tile != 0:
        # Ragged last seq tile: zero the out-of-range rows before summing
        # (Pallas pads OOB block reads with unspecified values).
        seq_idx = jax.lax.broadcasted_iota(jnp.int32, x.shape, 1) + s * seq_tile
        x = jnp.where(seq_idx < seq_len, x, 0.0)
    acc_ref[...] += jnp.sum(x, axis=1)

    # ---- epilogue: divide by lengths + MLP, only on the last seq tile ----
    @pl.when(s == pl.num_programs(1) - 1)
    def _epilogue():
        inv_len = pl.reciprocal(len_ref[...], approx=False)       # [TB, 1]
        pooled = acc_ref[...] * inv_len                           # [TB, E]

        # fc1 + ReLU
        h1 = jnp.dot(pooled, w1_ref[...], preferred_element_type=jnp.float32)
        h1 = jnp.maximum(h1 + b1_ref[...], 0.0)                   # [TB, FC1]

        # dropout1: identity in eval mode.

        # fc2 + ReLU
        h2 = jnp.dot(h1, w2_ref[...], preferred_element_type=jnp.float32)
        h2 = jnp.maximum(h2 + b2_ref[...], 0.0)                   # [TB, FC2]

        # fc3 (output lane-padded to a multiple of 128; sliced in wrapper)
        out = jnp.dot(h2, w3_ref[...], preferred_element_type=jnp.float32)
        o_ref[...] = (out + b3_ref[...]).astype(o_ref.dtype)      # [TB, O_pad]


def baseline_model(x, lengths, params, *, max_x_buffer_bytes=None):
    """x: [B, S, E] (f32 or bf16 -- streamed as-is), lengths: [B, 1] float32.
    Returns [B, O] float32.  `max_x_buffer_bytes` is a test hook that caps the
    per-buffer x block size (forces multi-step seq accumulation)."""
    w1, b1, w2, b2, w3, b3 = params
    B, S, E = x.shape
    O = w3.shape[1]
    itemsize = jnp.dtype(x.dtype).itemsize

    # Lane-dense output store: pad fc3's output dim to a multiple of 128.
    O_pad = max(_round_up(O, LANE), LANE)
    if O_pad != O:
        w3 = jnp.pad(w3, ((0, 0), (0, O_pad - O)))
        b3 = jnp.pad(b3, ((0, 0), (0, O_pad - O)))

    TB = _choose_batch_tile(B)

    # ---- generation-aware VMEM budget ----
    cap = _vmem_capacity_bytes()
    usable = int(cap * 0.75)                      # headroom for compiler scratch
    weight_bytes = 2 * sum(_vmem_block_bytes(a.shape, 4)         # charged double-
                           for a in (w1, b1, w2, b2, w3, b3))    # buffered (safe)
    acc_bytes = _vmem_block_bytes((TB, E), 4)
    out_bytes = 2 * _vmem_block_bytes((TB, O_pad), 4)
    len_bytes = 2 * _vmem_block_bytes((TB, 1), 4)
    x_budget = max(usable - weight_bytes - acc_bytes - out_bytes - len_bytes,
                   2 * 512 * 1024)
    per_buf = min(x_budget // 2, 16 * 1024 * 1024)     # <= 16 MiB per x buffer
    if max_x_buffer_bytes is not None:
        per_buf = min(per_buf, max_x_buffer_bytes)

    TS = _choose_seq_tile(S, TB, E, itemsize, per_buf)
    grid = (pl.cdiv(B, TB), pl.cdiv(S, TS))

    # Explicit VMEM limit from the estimated footprint (+ headroom).
    x_buf_bytes = _vmem_block_bytes((TB, TS, E), itemsize)
    est = 2 * x_buf_bytes + weight_bytes + acc_bytes + out_bytes + len_bytes
    vmem_limit = int(min(max(cap - 2 * 1024 * 1024, 32 * 1024 * 1024),
                         max(est + 8 * 1024 * 1024, 32 * 1024 * 1024)))

    kernel = functools.partial(baseline_kernel, seq_len=S, seq_tile=TS)
    out_shape = jax.ShapeDtypeStruct((B, O_pad), jnp.float32)
    out_spec = pl.BlockSpec((TB, O_pad), lambda b, s: (b, 0))
    scratch = [pltpu.VMEM((TB, E), jnp.float32)]           # f32 seq-sum acc
    cparams = pltpu.CompilerParams(
        dimension_semantics=("parallel", "arbitrary"),
        vmem_limit_bytes=vmem_limit)

    def run(single_buffer_weights):
        def resident(arr):
            nd = arr.ndim
            idx = lambda b, s: (0,) * nd
            if single_buffer_weights:
                # Constant index_map => no need for double-buffering the weights.
                return pl.BlockSpec(arr.shape, idx, pipeline_mode=pl.Buffered(1))
            return pl.BlockSpec(arr.shape, idx)

        in_specs = [
            pl.BlockSpec((TB, TS, E), lambda b, s: (b, s, 0)),   # streamed x tile
            pl.BlockSpec((TB, 1), lambda b, s: (b, 0)),          # lengths
            resident(w1), resident(b1),
            resident(w2), resident(b2),
            resident(w3), resident(b3),
        ]
        return pl.pallas_call(
            kernel,
            out_shape=out_shape,
            grid=grid,
            in_specs=in_specs,
            out_specs=out_spec,
            scratch_shapes=scratch,
            compiler_params=cparams,
        )(x, lengths, w1, b1, w2, b2, w3, b3)

    try:
        out = run(single_buffer_weights=True)
    except Exception:
        # Fallback if this build rejects pipeline_mode on a top-level
        # pallas_call BlockSpec; the VMEM budget already charges the weights
        # as double-buffered, so the plain specs are safe.
        out = run(single_buffer_weights=False)

    return out[:, :O]


def init_params(key, embedding_dim, fc1_width, fc2_width, output_dim):
    """Deterministic init mirroring BaseLineModel.reset_parameters().

    fc1/fc2: Kaiming-normal (fan_in, relu gain = sqrt(2)), bias = 0.
    fc3:     default nn.Linear reset (uniform(-1/sqrt(fan_in), 1/sqrt(fan_in))).
    Weights stored as [in, out].
    """
    k1, k2, k3w, k3b = jax.random.split(key, 4)

    def kaiming(k, fan_in, fan_out):
        std = (2.0 / fan_in) ** 0.5
        return jax.random.normal(k, (fan_in, fan_out), jnp.float32) * std

    w1 = kaiming(k1, embedding_dim, fc1_width)
    b1 = jnp.zeros((1, fc1_width), jnp.float32)
    w2 = kaiming(k2, fc1_width, fc2_width)
    b2 = jnp.zeros((1, fc2_width), jnp.float32)

    bound3 = 1.0 / (fc2_width ** 0.5)
    w3 = jax.random.uniform(k3w, (fc2_width, output_dim), jnp.float32,
                            -bound3, bound3)
    b3 = jax.random.uniform(k3b, (1, output_dim), jnp.float32,
                            -bound3, bound3)
    return w1, b1, w2, b2, w3, b3


def reference(x, lengths, params):
    """Plain-JAX reference of the forward pass."""
    w1, b1, w2, b2, w3, b3 = params
    pooled = jnp.sum(x.astype(jnp.float32), axis=1) / lengths
    h1 = jnp.maximum(pooled @ w1 + b1, 0.0)
    h2 = jnp.maximum(h1 @ w2 + b2, 0.0)
    return h2 @ w3 + b3


if __name__ == "__main__":
    key = jax.random.PRNGKey(0)

    # ---- config 1: tiny shapes consistent with the module ----
    B, S, E = 2, 8, 32          # batch, seq, embedding_dim
    FC1, FC2, OUT = 64, 32, 4   # fc1_width, fc2_width, output_dim

    kx, kl, kp, krest = jax.random.split(key, 4)
    x = jax.random.normal(kx, (B, S, E), jnp.float32)
    lengths = jax.random.randint(kl, (B, 1), 1, S + 1).astype(jnp.float32)
    params = init_params(kp, E, FC1, FC2, OUT)

    out = jax.block_until_ready(baseline_model(x, lengths, params))
    ref = reference(x, lengths, params)
    assert out.shape == (B, OUT)
    assert jnp.allclose(out, ref, atol=1e-5, rtol=1e-5)

    # bf16 inputs arriving from upstream (kernel streams them as-is and
    # accumulates in f32; no wrapper-side cast/copy of the dominant operand).
    x_bf16 = x.astype(jnp.bfloat16)
    out_bf16 = jax.block_until_ready(baseline_model(x_bf16, lengths, params))
    ref_bf16 = reference(x_bf16, lengths, params)
    assert jnp.allclose(out_bf16, ref_bf16, atol=1e-4, rtol=1e-4)

    # ---- config 2: exercise the batch split (2 'parallel' tiles), multi-step
    # seq accumulation and the ragged-last-tile mask via the budget test hook.
    B2, S2 = 16, 20
    kx2, kl2 = jax.random.split(krest)
    x2 = jax.random.normal(kx2, (B2, S2, E), jnp.float32)
    lengths2 = jax.random.randint(kl2, (B2, 1), 1, S2 + 1).astype(jnp.float32)
    out2 = jax.block_until_ready(
        baseline_model(x2, lengths2, params, max_x_buffer_bytes=4096))
    ref2 = reference(x2, lengths2, params)
    assert out2.shape == (B2, OUT)
    assert jnp.allclose(out2, ref2, atol=1e-5, rtol=1e-5)

    print("KERNEL_OK")
</pallas_src>

<mosaic_0001>
module attributes {stable_mosaic.version = 11 : i64} {
  func.func @baseline_kernel(%arg0: i32, %arg1: i32, %arg2: memref<2x8x32xf32, #tpu.memory_space<vmem>>, %arg3: memref<2x1xf32, #tpu.memory_space<vmem>>, %arg4: memref<32x64xf32, #tpu.memory_space<vmem>>, %arg5: memref<1x64xf32, #tpu.memory_space<vmem>>, %arg6: memref<64x32xf32, #tpu.memory_space<vmem>>, %arg7: memref<1x32xf32, #tpu.memory_space<vmem>>, %arg8: memref<32x128xf32, #tpu.memory_space<vmem>>, %arg9: memref<1x128xf32, #tpu.memory_space<vmem>>, %arg10: memref<2x128xf32, #tpu.memory_space<vmem>>, %arg11: memref<2x32xf32, #tpu.memory_space<vmem>>) attributes {dimension_semantics = [#tpu.dimension_semantics<parallel>, #tpu.dimension_semantics<arbitrary>], iteration_bounds = array<i64: 1, 1>, scalar_prefetch = 0 : i64, scratch_operands = 1 : i64, tpu.core_type = #tpu.core_type<tc>, window_params = [{transform_indices = @transform_0, window_bounds = array<i64: 2, 8, 32>}, {transform_indices = @transform_1, window_bounds = array<i64: 2, 1>}, {pipeline_mode = #tpu.pipeline_mode<synchronous>, transform_indices = @transform_2, window_bounds = array<i64: 32, 64>}, {pipeline_mode = #tpu.pipeline_mode<synchronous>, transform_indices = @transform_3, window_bounds = array<i64: 1, 64>}, {pipeline_mode = #tpu.pipeline_mode<synchronous>, transform_indices = @transform_4, window_bounds = array<i64: 64, 32>}, {pipeline_mode = #tpu.pipeline_mode<synchronous>, transform_indices = @transform_5, window_bounds = array<i64: 1, 32>}, {pipeline_mode = #tpu.pipeline_mode<synchronous>, transform_indices = @transform_6, window_bounds = array<i64: 32, 128>}, {pipeline_mode = #tpu.pipeline_mode<synchronous>, transform_indices = @transform_7, window_bounds = array<i64: 1, 128>}, {transform_indices = @transform_8, window_bounds = array<i64: 2, 128>}]} {
    %c0_i32 = arith.constant 0 : i32
    %0 = arith.cmpi eq, %arg1, %c0_i32 : i32
    %1 = arith.extui %0 : i1 to i32
    %c0_i32_0 = arith.constant 0 : i32
    %2 = arith.cmpi ne, %1, %c0_i32_0 : i32
    scf.if %2 {
      %cst_9 = arith.constant 0.000000e+00 : f32
      %11 = vector.broadcast %cst_9 : f32 to vector<2x32xf32>
      %c0_10 = arith.constant 0 : index
      %c0_11 = arith.constant 0 : index
      %12 = vector.load %arg11[%c0_10, %c0_11] : memref<2x32xf32, #tpu.memory_space<vmem>>, vector<2x32xf32>
      tpu.vector_store %arg11[%c0_10, %c0_11], %11 {strides = array<i32>} : memref<2x32xf32, #tpu.memory_space<vmem>>, vector<2x32xf32>,
    } else {
    }
    %c0 = arith.constant 0 : index
    %c0_1 = arith.constant 0 : index
    %c0_2 = arith.constant 0 : index
    %3 = vector.load %arg2[%c0, %c0_1, %c0_2] : memref<2x8x32xf32, #tpu.memory_space<vmem>>, vector<2x8x32xf32>
    %c0_3 = arith.constant 0 : index
    %c0_4 = arith.constant 0 : index
    %4 = vector.load %arg11[%c0_3, %c0_4] : memref<2x32xf32, #tpu.memory_space<vmem>>, vector<2x32xf32>
    %cst = arith.constant dense<0.000000e+00> : vector<2x32xf32>
    %5 = vector.multi_reduction <add>, %3, %cst [1] : vector<2x8x32xf32> to vector<2x32xf32>
    %6 = arith.addf %4, %5 : vector<2x32xf32>
    %c0_5 = arith.constant 0 : index
    %c0_6 = arith.constant 0 : index
    %7 = vector.load %arg11[%c0_5, %c0_6] : memref<2x32xf32, #tpu.memory_space<vmem>>, vector<2x32xf32>
    tpu.vector_store %arg11[%c0_5, %c0_6], %6 {strides = array<i32>} : memref<2x32xf32, #tpu.memory_space<vmem>>, vector<2x32xf32>,
    %c0_i32_7 = arith.constant 0 : i32
    %8 = arith.cmpi eq, %arg1, %c0_i32_7 : i32
    %9 = arith.extui %8 : i1 to i32
    %c0_i32_8 = arith.constant 0 : i32
    %10 = arith.cmpi ne, %9, %c0_i32_8 : i32
    scf.if %10 {
      %c0_9 = arith.constant 0 : index
      %c0_10 = arith.constant 0 : index
      %11 = vector.load %arg3[%c0_9, %c0_10] : memref<2x1xf32, #tpu.memory_space<vmem>>, vector<2x1xf32>
      %12 = tpu.reciprocal %11 : vector<2x1xf32> -> vector<2x1xf32>
      %c0_11 = arith.constant 0 : index
      %c0_12 = arith.constant 0 : index
      %13 = vector.load %arg11[%c0_11, %c0_12] : memref<2x32xf32, #tpu.memory_space<vmem>>, vector<2x32xf32>
      %14 = vector.broadcast %12 : vector<2x1xf32> to vector<2x32xf32>
      %15 = arith.mulf %13, %14 : vector<2x32xf32>
      %c0_13 = arith.constant 0 : index
      %c0_14 = arith.constant 0 : index
      %16 = vector.load %arg4[%c0_13, %c0_14] : memref<32x64xf32, #tpu.memory_space<vmem>>, vector<32x64xf32>
      %cst_15 = arith.constant dense<0.000000e+00> : vector<2x64xf32>
      %17 = tpu.matmul %15, %16, %cst_15 {dimension_numbers = #tpu.dot_dimension_numbers<[1], [0], [0], [1], [0, 0, 1, 1], [], []>} : vector<2x32xf32>, vector<32x64xf32>, vector<2x64xf32> -> vector<2x64xf32>
      %c0_16 = arith.constant 0 : index
      %c0_17 = arith.constant 0 : index
      %18 = vector.load %arg5[%c0_16, %c0_17] : memref<1x64xf32, #tpu.memory_space<vmem>>, vector<1x64xf32>
      %19 = vector.broadcast %18 : vector<1x64xf32> to vector<2x64xf32>
      %20 = arith.addf %17, %19 : vector<2x64xf32>
      %cst_18 = arith.constant 0.000000e+00 : f32
      %21 = vector.broadcast %cst_18 : f32 to vector<2x64xf32>
      %22 = arith.maximumf %20, %21 : vector<2x64xf32>
      %c0_19 = arith.constant 0 : index
      %c0_20 = arith.constant 0 : index
      %23 = vector.load %arg6[%c0_19, %c0_20] : memref<64x32xf32, #tpu.memory_space<vmem>>, vector<64x32xf32>
      %cst_21 = arith.constant dense<0.000000e+00> : vector<2x32xf32>
      %24 = tpu.matmul %22, %23, %cst_21 {dimension_numbers = #tpu.dot_dimension_numbers<[1], [0], [0], [1], [0, 0, 1, 1], [], []>} : vector<2x64xf32>, vector<64x32xf32>, vector<2x32xf32> -> vector<2x32xf32>
      %c0_22 = arith.constant 0 : index
      %c0_23 = arith.constant 0 : index
      %25 = vector.load %arg7[%c0_22, %c0_23] : memref<1x32xf32, #tpu.memory_space<vmem>>, vector<1x32xf32>
      %26 = vector.broadcast %25 : vector<1x32xf32> to vector<2x32xf32>
      %27 = arith.addf %24, %26 : vector<2x32xf32>
      %cst_24 = arith.constant 0.000000e+00 : f32
      %28 = vector.broadcast %cst_24 : f32 to vector<2x32xf32>
      %29 = arith.maximumf %27, %28 : vector<2x32xf32>
      %c0_25 = arith.constant 0 : index
      %c0_26 = arith.constant 0 : index
      %30 = vector.load %arg8[%c0_25, %c0_26] : memref<32x128xf32, #tpu.memory_space<vmem>>, vector<32x128xf32>
      %cst_27 = arith.constant dense<0.000000e+00> : vector<2x128xf32>
      %31 = tpu.matmul %29, %30, %cst_27 {dimension_numbers = #tpu.dot_dimension_numbers<[1], [0], [0], [1], [0, 0, 1, 1], [], []>} : vector<2x32xf32>, vector<32x128xf32>, vector<2x128xf32> -> vector<2x128xf32>
      %c0_28 = arith.constant 0 : index
      %c0_29 = arith.constant 0 : index
      %32 = vector.load %arg9[%c0_28, %c0_29] : memref<1x128xf32, #tpu.memory_space<vmem>>, vector<1x128xf32>
      %33 = vector.broadcast %32 : vector<1x128xf32> to vector<2x128xf32>
      %34 = arith.addf %31, %33 : vector<2x128xf32>
      %c0_30 = arith.constant 0 : index
      %c0_31 = arith.constant 0 : index
      %35 = vector.load %arg10[%c0_30, %c0_31] : memref<2x128xf32, #tpu.memory_space<vmem>>, vector<2x128xf32>
      tpu.vector_store %arg10[%c0_30, %c0_31], %34 {strides = array<i32>} : memref<2x128xf32, #tpu.memory_space<vmem>>, vector<2x128xf32>,
    } else {
    }
    return
  }
  func.func @transform_0(%arg0: i32, %arg1: i32) -> (i32, i32, i32) {
    %c0_i32 = arith.constant 0 : i32
    %c0_i32_0 = arith.constant 0 : i32
    return %arg0, %arg1, %c0_i32 : i32, i32, i32
  }
  func.func @transform_1(%arg0: i32, %arg1: i32) -> (i32, i32) {
    %c0_i32 = arith.constant 0 : i32
    %c0_i32_0 = arith.constant 0 : i32
    return %arg0, %c0_i32 : i32, i32
  }
  func.func @transform_2(%arg0: i32, %arg1: i32) -> (i32, i32) {
    %c0_i32 = arith.constant 0 : i32
    %c0_i32_0 = arith.constant 0 : i32
    %c0_i32_1 = arith.constant 0 : i32
    return %c0_i32, %c0_i32_0 : i32, i32
  }
  func.func @transform_3(%arg0: i32, %arg1: i32) -> (i32, i32) {
    %c0_i32 = arith.constant 0 : i32
    %c0_i32_0 = arith.constant 0 : i32
    %c0_i32_1 = arith.constant 0 : i32
    return %c0_i32, %c0_i32_0 : i32, i32
  }
  func.func @transform_4(%arg0: i32, %arg1: i32) -> (i32, i32) {
    %c0_i32 = arith.constant 0 : i32
    %c0_i32_0 = arith.constant 0 : i32
    %c0_i32_1 = arith.constant 0 : i32
    return %c0_i32, %c0_i32_0 : i32, i32
  }
  func.func @transform_5(%arg0: i32, %arg1: i32) -> (i32, i32) {
    %c0_i32 = arith.constant 0 : i32
    %c0_i32_0 = arith.constant 0 : i32
    %c0_i32_1 = arith.constant 0 : i32
    return %c0_i32, %c0_i32_0 : i32, i32
  }
  func.func @transform_6(%arg0: i32, %arg1: i32) -> (i32, i32) {
    %c0_i32 = arith.constant 0 : i32
    %c0_i32_0 = arith.constant 0 : i32
    %c0_i32_1 = arith.constant 0 : i32
    return %c0_i32, %c0_i32_0 : i32, i32
  }
  func.func @transform_7(%arg0: i32, %arg1: i32) -> (i32, i32) {
    %c0_i32 = arith.constant 0 : i32
    %c0_i32_0 = arith.constant 0 : i32
    %c0_i32_1 = arith.constant 0 : i32
    return %c0_i32, %c0_i32_0 : i32, i32
  }
  func.func @transform_8(%arg0: i32, %arg1: i32) -> (i32, i32) {
    %c0_i32 = arith.constant 0 : i32
    %c0_i32_0 = arith.constant 0 : i32
    return %arg0, %c0_i32 : i32, i32
  }
}

module attributes {stable_mosaic.version = 11 : i64} {
  func.func @baseline_kernel(%arg0: i32, %arg1: i32, %arg2: memref<2x8x32xf32, #tpu.memory_space<vmem>>, %arg3: memref<2x1xf32, #tpu.memory_space<vmem>>, %arg4: memref<32x64xf32, #tpu.memory_space<vmem>>, %arg5: memref<1x64xf32, #tpu.memory_space<vmem>>, %arg6: memref<64x32xf32, #tpu.memory_space<vmem>>, %arg7: memref<1x32xf32, #tpu.memory_space<vmem>>, %arg8: memref<32x128xf32, #tpu.memory_space<vmem>>, %arg9: memref<1x128xf32, #tpu.memory_space<vmem>>, %arg10: memref<2x128xf32, #tpu.memory_space<vmem>>, %arg11: memref<2x32xf32, #tpu.memory_space<vmem>>) attributes {dimension_semantics = [#tpu.dimension_semantics<parallel>, #tpu.dimension_semantics<arbitrary>], iteration_bounds = array<i64: 1, 1>, scalar_prefetch = 0 : i64, scratch_operands = 1 : i64, tpu.core_type = #tpu.core_type<tc>, window_params = [{transform_indices = @transform_0, window_bounds = array<i64: 2, 8, 32>}, {transform_indices = @transform_1, window_bounds = array<i64: 2, 1>}, {pipeline_mode = #tpu.pipeline_mode<synchronous>, transform_indices = @transform_2, window_bounds = array<i64: 32, 64>}, {pipeline_mode = #tpu.pipeline_mode<synchronous>, transform_indices = @transform_3, window_bounds = array<i64: 1, 64>}, {pipeline_mode = #tpu.pipeline_mode<synchronous>, transform_indices = @transform_4, window_bounds = array<i64: 64, 32>}, {pipeline_mode = #tpu.pipeline_mode<synchronous>, transform_indices = @transform_5, window_bounds = array<i64: 1, 32>}, {pipeline_mode = #tpu.pipeline_mode<synchronous>, transform_indices = @transform_6, window_bounds = array<i64: 32, 128>}, {pipeline_mode = #tpu.pipeline_mode<synchronous>, transform_indices = @transform_7, window_bounds = array<i64: 1, 128>}, {transform_indices = @transform_8, window_bounds = array<i64: 2, 128>}]} {
    %c0_i32 = arith.constant 0 : i32
    %0 = arith.cmpi eq, %arg1, %c0_i32 : i32
    %1 = arith.extui %0 : i1 to i32
    %c0_i32_0 = arith.constant 0 : i32
    %2 = arith.cmpi ne, %1, %c0_i32_0 : i32
    scf.if %2 {
      %cst_9 = arith.constant 0.000000e+00 : f32
      %11 = vector.broadcast %cst_9 : f32 to vector<2x32xf32>
      %c0_10 = arith.constant 0 : index
      %c0_11 = arith.constant 0 : index
      %12 = vector.load %arg11[%c0_10, %c0_11] : memref<2x32xf32, #tpu.memory_space<vmem>>, vector<2x32xf32>
      tpu.vector_store %arg11[%c0_10, %c0_11], %11 {strides = array<i32>} : memref<2x32xf32, #tpu.memory_space<vmem>>, vector<2x32xf32>,
    } else {
    }
    %c0 = arith.constant 0 : index
    %c0_1 = arith.constant 0 : index
    %c0_2 = arith.constant 0 : index
    %3 = vector.load %arg2[%c0, %c0_1, %c0_2] : memref<2x8x32xf32, #tpu.memory_space<vmem>>, vector<2x8x32xf32>
    %c0_3 = arith.constant 0 : index
    %c0_4 = arith.constant 0 : index
    %4 = vector.load %arg11[%c0_3, %c0_4] : memref<2x32xf32, #tpu.memory_space<vmem>>, vector<2x32xf32>
    %cst = arith.constant dense<0.000000e+00> : vector<2x32xf32>
    %5 = vector.multi_reduction <add>, %3, %cst [1] : vector<2x8x32xf32> to vector<2x32xf32>
    %6 = arith.addf %4, %5 : vector<2x32xf32>
    %c0_5 = arith.constant 0 : index
    %c0_6 = arith.constant 0 : index
    %7 = vector.load %arg11[%c0_5, %c0_6] : memref<2x32xf32, #tpu.memory_space<vmem>>, vector<2x32xf32>
    tpu.vector_store %arg11[%c0_5, %c0_6], %6 {strides = array<i32>} : memref<2x32xf32, #tpu.memory_space<vmem>>, vector<2x32xf32>,
    %c0_i32_7 = arith.constant 0 : i32
    %8 = arith.cmpi eq, %arg1, %c0_i32_7 : i32
    %9 = arith.extui %8 : i1 to i32
    %c0_i32_8 = arith.constant 0 : i32
    %10 = arith.cmpi ne, %9, %c0_i32_8 : i32
    scf.if %10 {
      %c0_9 = arith.constant 0 : index
      %c0_10 = arith.constant 0 : index
      %11 = vector.load %arg3[%c0_9, %c0_10] : memref<2x1xf32, #tpu.memory_space<vmem>>, vector<2x1xf32>
      %12 = tpu.reciprocal %11 : vector<2x1xf32> -> vector<2x1xf32>
      %c0_11 = arith.constant 0 : index
      %c0_12 = arith.constant 0 : index
      %13 = vector.load %arg11[%c0_11, %c0_12] : memref<2x32xf32, #tpu.memory_space<vmem>>, vector<2x32xf32>
      %14 = vector.broadcast %12 : vector<2x1xf32> to vector<2x32xf32>
      %15 = arith.mulf %13, %14 : vector<2x32xf32>
      %c0_13 = arith.constant 0 : index
      %c0_14 = arith.constant 0 : index
      %16 = vector.load %arg4[%c0_13, %c0_14] : memref<32x64xf32, #tpu.memory_space<vmem>>, vector<32x64xf32>
      %cst_15 = arith.constant dense<0.000000e+00> : vector<2x64xf32>
      %17 = tpu.matmul %15, %16, %cst_15 {dimension_numbers = #tpu.dot_dimension_numbers<[1], [0], [0], [1], [0, 0, 1, 1], [], []>} : vector<2x32xf32>, vector<32x64xf32>, vector<2x64xf32> -> vector<2x64xf32>
      %c0_16 = arith.constant 0 : index
      %c0_17 = arith.constant 0 : index
      %18 = vector.load %arg5[%c0_16, %c0_17] : memref<1x64xf32, #tpu.memory_space<vmem>>, vector<1x64xf32>
      %19 = vector.broadcast %18 : vector<1x64xf32> to vector<2x64xf32>
      %20 = arith.addf %17, %19 : vector<2x64xf32>
      %cst_18 = arith.constant 0.000000e+00 : f32
      %21 = vector.broadcast %cst_18 : f32 to vector<2x64xf32>
      %22 = arith.maximumf %20, %21 : vector<2x64xf32>
      %c0_19 = arith.constant 0 : index
      %c0_20 = arith.constant 0 : index
      %23 = vector.load %arg6[%c0_19, %c0_20] : memref<64x32xf32, #tpu.memory_space<vmem>>, vector<64x32xf32>
      %cst_21 = arith.constant dense<0.000000e+00> : vector<2x32xf32>
      %24 = tpu.matmul %22, %23, %cst_21 {dimension_numbers = #tpu.dot_dimension_numbers<[1], [0], [0], [1], [0, 0, 1, 1], [], []>} : vector<2x64xf32>, vector<64x32xf32>, vector<2x32xf32> -> vector<2x32xf32>
      %c0_22 = arith.constant 0 : index
      %c0_23 = arith.constant 0 : index
      %25 = vector.load %arg7[%c0_22, %c0_23] : memref<1x32xf32, #tpu.memory_space<vmem>>, vector<1x32xf32>
      %26 = vector.broadcast %25 : vector<1x32xf32> to vector<2x32xf32>
      %27 = arith.addf %24, %26 : vector<2x32xf32>
      %cst_24 = arith.constant 0.000000e+00 : f32
      %28 = vector.broadcast %cst_24 : f32 to vector<2x32xf32>
      %29 = arith.maximumf %27, %28 : vector<2x32xf32>
      %c0_25 = arith.constant 0 : index
      %c0_26 = arith.constant 0 : index
      %30 = vector.load %arg8[%c0_25, %c0_26] : memref<32x128xf32, #tpu.memory_space<vmem>>, vector<32x128xf32>
      %cst_27 = arith.constant dense<0.000000e+00> : vector<2x128xf32>
      %31 = tpu.matmul %29, %30, %cst_27 {dimension_numbers = #tpu.dot_dimension_numbers<[1], [0], [0], [1], [0, 0, 1, 1], [], []>} : vector<2x32xf32>, vector<32x128xf32>, vector<2x128xf32> -> vector<2x128xf32>
      %c0_28 = arith.constant 0 : index
      %c0_29 = arith.constant 0 : index
      %32 = vector.load %arg9[%c0_28, %c0_29] : memref<1x128xf32, #tpu.memory_space<vmem>>, vector<1x128xf32>
      %33 = vector.broadcast %32 : vector<1x128xf32> to vector<2x128xf32>
      %34 = arith.addf %31, %33 : vector<2x128xf32>
      %c0_30 = arith.constant 0 : index
      %c0_31 = arith.constant 0 : index
      %35 = vector.load %arg10[%c0_30, %c0_31] : memref<2x128xf32, #tpu.memory_space<vmem>>, vector<2x128xf32>
      tpu.vector_store %arg10[%c0_30, %c0_31], %34 {strides = array<i32>} : memref<2x128xf32, #tpu.memory_space<vmem>>, vector<2x128xf32>,
    } else {
    }
    return
  }
  func.func @transform_0(%arg0: i32, %arg1: i32) -> (i32, i32, i32) {
    %c0_i32 = arith.constant 0 : i32
    %c0_i32_0 = arith.constant 0 : i32
    return %arg0, %arg1, %c0_i32 : i32, i32, i32
  }
  func.func @transform_1(%arg0: i32, %arg1: i32) -> (i32, i32) {
    %c0_i32 = arith.constant 0 : i32
    %c0_i32_0 = arith.constant 0 : i32
    return %arg0, %c0_i32 : i32, i32
  }
  func.func @transform_2(%arg0: i32, %arg1: i32) -> (i32, i32) {
    %c0_i32 = arith.constant 0 : i32
    %c0_i32_0 = arith.constant 0 : i32
    %c0_i32_1 = arith.constant 0 : i32
    return %c0_i32, %c0_i32_0 : i32, i32
  }
  func.func @transform_3(%arg0: i32, %arg1: i32) -> (i32, i32) {
    %c0_i32 = arith.constant 0 : i32
    %c0_i32_0 = arith.constant 0 : i32
    %c0_i32_1 = arith.constant 0 : i32
    return %c0_i32, %c0_i32_0 : i32, i32
  }
  func.func @transform_4(%arg0: i32, %arg1: i32) -> (i32, i32) {
    %c0_i32 = arith.constant 0 : i32
    %c0_i32_0 = arith.constant 0 : i32
    %c0_i32_1 = arith.constant 0 : i32
    return %c0_i32, %c0_i32_0 : i32, i32
  }
  func.func @transform_5(%arg0: i32, %arg1: i32) -> (i32, i32) {
    %c0_i32 = arith.constant 0 : i32
    %c0_i32_0 = arith.constant 0 : i32
    %c0_i32_1 = arith.constant 0 : i32
    return %c0_i32, %c0_i32_0 : i32, i32
  }
  func.func @transform_6(%arg0: i32, %arg1: i32) -> (i32, i32) {
    %c0_i32 = arith.constant 0 : i32
    %c0_i32_0 = arith.constant 0 : i32
    %c0_i32_1 = arith.constant 0 : i32
    return %c0_i32, %c0_i32_0 : i32, i32
  }
  func.func @transform_7(%arg0: i32, %arg1: i32) -> (i32, i32) {
    %c0_i32 = arith.constant 0 : i32
    %c0_i32_0 = arith.constant 0 : i32
    %c0_i32_1 = arith.constant 0 : i32
    return %c0_i32, %c0_i32_0 : i32, i32
  }
  func.func @transform_8(%arg0: i32, %arg1: i32) -> (i32, i32) {
    %c0_i32 = arith.constant 0 : i32
    %c0_i32_0 = arith.constant 0 : i32
    return %arg0, %c0_i32 : i32, i32
  }
}

</mosaic_0001>

<bundles_post_ra>
// kernel: tpu_custom_call.1
= control target key start
LH: loop header
LB: loop body
LE: loop exit
PB: predicated region body
PF: predicated region fallthrough
CT: control target
= control target key end

     0   :  { %v470_v3 = vmov 0   ;;  %v471_v4 = vmov 0.0|0.0   ;;  %vm34_vm0 = vcmask 254976   ;;  %v472_v9 = vmov 0.0   ;;  %s615_s0 = inlined_call_operand.vmem [shape: f32[2,8,32], index: 0, kind: input, shape index: {}]   ;;  %s616_s1 = inlined_call_operand.vmem [shape: f32[2,1], index: 1, kind: input, shape index: {}]   ;;  %s617_s2 = inlined_call_operand.vmem [shape: f32[32,64], index: 2, kind: input, shape index: {}]   ;;  %s618_s3 = inlined_call_operand.vmem [shape: f32[1,64], index: 3, kind: input, shape index: {}]   ;;  %s619_s4 = inlined_call_operand.vmem [shape: f32[64,32], index: 4, kind: input, shape index: {}]   ;;  %s620_s5 = inlined_call_operand.vmem [shape: f32[1,32], index: 5, kind: input, shape index: {}]   ;;  %s621_s6 = inlined_call_operand.vmem [shape: f32[32,128], index: 6, kind: input, shape index: {}]   ;;  %s622_s7 = inlined_call_operand.vmem [shape: f32[1,128], index: 7, kind: input, shape index: {}]   ;;  %s623_s8 = inlined_call_operand.hbm [shape: f32[2,128], index: 8, kind: output, shape index: {}]  }
   0x1   :  { %v65_v0 = vld [vmem:[%s616_s1] sm:$0x3]  ;;  %v75_v2 = vld [vmem:[%s617_s2 + $0x8] sm:$0xff]  ;;  %443 = vset.pattern.permute.xlu0 %v470_v3  ;;  %414 = vmatprep.subr.bf16.mxu0 %v471_v4  ;;  %v76_v6 = vld [vmem:[%s617_s2 + $0x10] sm:$0xff]  ;;  %35 = vst.msk [vmem:[#allocation2] sm:$0x3] %vm34_vm0, %v472_v9 }
   0x2   :  { %v74_v1 = vld [vmem:[%s617_s2] sm:$0xff]  ;;  %444 = vrcp.f32 %v65_v0  ;;  %v77_v7 = vld [vmem:[%s617_s2 + $0x18] sm:$0xff]  ;;  %v37_v10 = vld [vmem:[%s615_s0 + $0x8] sm:$0xff]  ;;  %vm39_vm1 = vcmask 261120   ;;  %420 = vmatprep.subr.bf16.mxu1 %v471_v4 }
   0x3   :  { %v415_v5 = vpack.c.bf16 %v75_v2, %v74_v1  ;;  %v36_v8 = vld [vmem:[%s615_s0] sm:$0xff] }
   0x4   :  { %13 = vsyncpa [#allocation4], 0  ;;  %v418_v11 = vpack.c.bf16 %v77_v7, %v76_v6  ;;  %v40_v12 = vsel %vm39_vm1, %v36_v8, 0.0  ;;  %v47_v13 = vsel %vm39_vm1, %v37_v10, 0.0  ;;  %vm56_vm2 = vcmask 1041409   ;;  %v159_v28 = vld [vmem:[%s619_s4] sm:$0xff] }
   0x5   :  { %416 = vmatpush3.bf16.msra.mxu0 %v415_v5  ;;  %v41_v14 = vrot.slane %v40_v12, 4  ;;  %v48_v15 = vrot.slane %v47_v13, 4  ;;  %vm473_vm3 = vmmov 0   ;;  %v160_v29 = vld [vmem:[%s619_s4 + $0x8] sm:$0xff]  ;;  %v161_v30 = vld [vmem:[%s619_s4 + $0x10] sm:$0xff]  ;;  %v162_v32 = vld [vmem:[%s619_s4 + $0x18] sm:$0xff] }
   0x6   :  { %417 = vmatprep.subr.bf16.mxu0 %v471_v4  ;;  %381 = vmatprep.mubr.msk.f32.mxu0 %vm473_vm3, %v472_v9  ;;  %v421_v31 = vpack.c.bf16 %v160_v29, %v159_v28  ;;  %v424_v35 = vpack.c.bf16 %v162_v32, %v161_v30  ;;  %v163_v36 = vld [vmem:[%s619_s4 + $0x20] sm:$0xff]  ;;  %v164_v37 = vld [vmem:[%s619_s4 + $0x28] sm:$0xff]  ;;  %v165_v42 = vld [vmem:[%s619_s4 + $0x30] sm:$0xff]  ;;  %vm174_vm4 = vcmask 523264   ;;  %s474_s19 = smov [#allocation3]  }
   0x7   :  { %v42_v16 = vadd.f32 %v41_v14, %v40_v12  ;;  %v49_v17 = vadd.f32 %v48_v15, %v47_v13  ;;  %400 = vmatprep.mubr.msk.f32.mxu1 %vm473_vm3, %v472_v9  ;;  %v427_v38 = vpack.c.bf16 %v164_v37, %v163_v36  ;;  %v166_v43 = vld [vmem:[%s619_s4 + $0x38] sm:$0xff]  ;;  %v249_v45 = vld [vmem:[%s621_s6] sm:$0xff]  ;;  %v250_v46 = vld [vmem:[%s621_s6 + $0x8] sm:$0xff]  ;;  %s340_s20 = sshll.u32 %s474_s19, 4  ;;  %s341_s20 = int_to_ptr.vmem [resolvable:$true] %s340_s20 }
   0x8   :  { %v38_v25 = vld [vmem:[#allocation2] sm:$0x3]  ;;  %422 = vmatpush3.bf16.msra.mxu1 %v421_v31  ;;  %v430_v44 = vpack.c.bf16 %v166_v43, %v165_v42  ;;  %v433_v47 = vpack.c.bf16 %v250_v46, %v249_v45  ;;  %v251_v53 = vld [vmem:[%s621_s6 + $0x10] sm:$0xff]  ;;  %v252_v54 = vld [vmem:[%s621_s6 + $0x18] sm:$0xff]  ;;  %s446_s6 = scalar_lea.vmem %s341_s20, 32  ;;  %p451_p1 = scmp.lt.s32.totalorder %s341_s20, %s341_s20 }
   0x9   :  { %419 = vmatpush3.bf16.msra.mxu0 %v418_v11  ;;  %v43_v18 = vrot.slane %v42_v16, 2  ;;  %v50_v19 = vrot.slane %v49_v17, 2  ;;  %423 = vmatprep.subr.bf16.mxu1 %v471_v4  ;;  %v348_v48 = vld [vmem:[%s618_s3] ss:$0 sm:$0xff]  ;;  %v436_v55 = vpack.c.bf16 %v252_v54, %v251_v53  ;;  %p447_p0 = scmp.ne.s32.totalorder %s341_s20, %s446_s6  ;;  %p452_p2 = scmp.lt.s32.totalorder %s446_s6, %s446_s6 }
   0xa   :  { %432 = vmatprep.subr.bf16.mxu0 %v471_v4  ;;  %v350_v56 = vld [vmem:[%s620_s5] ss:$0 sm:$0xff] }
   0xb   :  { %v44_v20 = vadd.f32 %v43_v18, %v42_v16  ;;  %v51_v21 = vadd.f32 %v50_v19, %v49_v17  ;;  %v352_v61 = vld [vmem:[%s622_s7] ss:$0 sm:$0xff]  ;;  %p453_p3 = por %p452_p2, %p451_p1 }
   0xc   :  { %v445_v22 = vpop.eup %444  ;;  %425 = vmatpush3.bf16.msra.mxu1 %v424_v35 }
   0xd   :  { %70 = vperm.xlu0 %443, %v445_v22   ;;  %v45_v23 = vrot.slane %v44_v20, 1  ;;  %v52_v24 = vrot.slane %v51_v21, 1  ;;  %426 = vmatprep.subr.bf16.mxu1 %v471_v4  ;;  %p454_p4 = pnand %p453_p3, %p447_p0 }
   0xf   :  { %v46_v26 = vadd.f32 %v45_v23, %v44_v20  ;;  %v53_v27 = vadd.f32 %v52_v24, %v51_v21 }
  0x10   :  { %428 = vmatpush3.bf16.msra.mxu1 %v427_v38 }
  0x11   :  { %v57_v33 = vsel %vm56_vm2, %v53_v27, %v46_v26  ;;  %429 = vmatprep.subr.bf16.mxu1 %v471_v4 }
  0x12   :  { %v59_v34 = vadd.f32 %v57_v33, %v38_v25 }
  0x14   :  { %61 = vst.msk [vmem:[#allocation2] sm:$0x3] %vm34_vm0, %v59_v34  ;;  %431 = vmatpush3.bf16.msra.mxu1 %v430_v44 }
  0x1b   :  { %v67_v39 = vld [vmem:[#allocation2] sm:$0x3] }
  0x8c   :  { %v71_v40 = vpop.permute.xlu0 %70 }
  0x8d   :  { %v73_v41 = vmul.f32 %v71_v40, %v67_v39 }
  0x8f   :  { %382 = vmatmul.mubr.msk.f32.vlgmr.msra.gmra.mrb[0].mxu0 %vm39_vm1, %v73_v41 }
  0x90   :  { %411 = vmatprep.mubr.msk.f32.mxu0 %vm473_vm3, %v472_v9  ;;  %434 = vmatpush3.bf16.msra.mxu0 %v433_v47 }
  0x91   :  { %435 = vmatprep.subr.bf16.mxu0 %v471_v4 }
  0x94   :  { %437 = vmatpush3.bf16.msra.mxu0 %v436_v55 }
 0x162   :  { %v154_v49 = vpop.f32.mrb[0].mxu0 }
 0x163   :  { %v155_v50 = vadd.f32 %v348_v48, %v154_v49  ;;  %v383_v51 = vpop.f32.mrb[1].mxu0 }
 0x165   :  { %v158_v52 = vmax.f32 %v155_v50, 0.0 }
 0x167   :  { %401 = vmatmul.mubr.msk.f32.vlgmr.msra.gmra.mrb[0].mxu1 %vm174_vm4, %v158_v52 }
 0x23a   :  { %v244_v57 = vpop.f32.mrb[0].mxu1 }
 0x23b   :  { %v245_v58 = vadd.f32 %v350_v56, %v244_v57  ;;  %v402_v59 = vpop.f32.mrb[1].mxu1 }
 0x23d   :  { %v248_v60 = vmax.f32 %v245_v58, 0.0 }
 0x23f   :  { %412 = vmatmul.mubr.msk.f32.vlgmr.msra.gmra.mrb[2].mxu0 %vm39_vm1, %v248_v60 }
 0x312   :  { %v329_v62 = vpop.f32.mrb[2].mxu0 }
 0x313   :  { %v330_v63 = vadd.f32 %v352_v61, %v329_v62  ;;  %v413_v0 = vpop.f32.mrb[3].mxu0 }
 0x315   :  { %333 = vst [vmem:[#allocation3] sm:$0x3] %v330_v63 }
 0x316   :  { %457 = shalt.err (!%p454_p4)
}
 0x317   :  { %s458_s22 = scalar_lea.hbm %s623_s8, 32 }
 0x318   :  { %p459_p5 = scmp.ne.s32.totalorder %s623_s8, %s458_s22  ;;  %p462_p6 = scmp.lt.u32.totalorder %s458_s22, %s623_s8 }
 0x31a   :  { %p464_p7 = pnand %p462_p6, %p459_p5 }
 0x31c   :  { %467 = shalt.err (!%p464_p7)
}
 0x31d   :  { %343 = dma.vmem_to_hbm [thread:$0]  %s341_s20, 32, %s623_s8, [#allocation4]  }
 0x31e   :  { %468 = dma.done.wait [#allocation4], 32  }
 0x31f   :  { %469 = vsyncadd [#allocation4], 4294967264 }
 0x320   :  { %347 = vsyncpa [#allocation4], 1 }

// kernel: tpu_custom_call.1
= control target key start
LH: loop header
LB: loop body
LE: loop exit
PB: predicated region body
PF: predicated region fallthrough
CT: control target
= control target key end

     0   :  { %v470_v3 = vmov 0   ;;  %v471_v4 = vmov 0.0|0.0   ;;  %vm34_vm0 = vcmask 254976   ;;  %v472_v9 = vmov 0.0   ;;  %s615_s0 = inlined_call_operand.vmem [shape: f32[2,8,32], index: 0, kind: input, shape index: {}]   ;;  %s616_s1 = inlined_call_operand.vmem [shape: f32[2,1], index: 1, kind: input, shape index: {}]   ;;  %s617_s2 = inlined_call_operand.vmem [shape: f32[32,64], index: 2, kind: input, shape index: {}]   ;;  %s618_s3 = inlined_call_operand.vmem [shape: f32[1,64], index: 3, kind: input, shape index: {}]   ;;  %s619_s4 = inlined_call_operand.vmem [shape: f32[64,32], index: 4, kind: input, shape index: {}]   ;;  %s620_s5 = inlined_call_operand.vmem [shape: f32[1,32], index: 5, kind: input, shape index: {}]   ;;  %s621_s6 = inlined_call_operand.vmem [shape: f32[32,128], index: 6, kind: input, shape index: {}]   ;;  %s622_s7 = inlined_call_operand.vmem [shape: f32[1,128], index: 7, kind: input, shape index: {}]   ;;  %s623_s8 = inlined_call_operand.hbm [shape: f32[2,128], index: 8, kind: output, shape index: {}]  }
   0x1   :  { %v65_v0 = vld [vmem:[%s616_s1] sm:$0x3]  ;;  %v75_v2 = vld [vmem:[%s617_s2 + $0x8] sm:$0xff]  ;;  %443 = vset.pattern.permute.xlu0 %v470_v3  ;;  %414 = vmatprep.subr.bf16.mxu0 %v471_v4  ;;  %v76_v6 = vld [vmem:[%s617_s2 + $0x10] sm:$0xff]  ;;  %35 = vst.msk [vmem:[#allocation2] sm:$0x3] %vm34_vm0, %v472_v9 }
   0x2   :  { %v74_v1 = vld [vmem:[%s617_s2] sm:$0xff]  ;;  %444 = vrcp.f32 %v65_v0  ;;  %v77_v7 = vld [vmem:[%s617_s2 + $0x18] sm:$0xff]  ;;  %v37_v10 = vld [vmem:[%s615_s0 + $0x8] sm:$0xff]  ;;  %vm39_vm1 = vcmask 261120   ;;  %420 = vmatprep.subr.bf16.mxu1 %v471_v4 }
   0x3   :  { %v415_v5 = vpack.c.bf16 %v75_v2, %v74_v1  ;;  %v36_v8 = vld [vmem:[%s615_s0] sm:$0xff] }
   0x4   :  { %13 = vsyncpa [#allocation4], 0  ;;  %v418_v11 = vpack.c.bf16 %v77_v7, %v76_v6  ;;  %v40_v12 = vsel %vm39_vm1, %v36_v8, 0.0  ;;  %v47_v13 = vsel %vm39_vm1, %v37_v10, 0.0  ;;  %vm56_vm2 = vcmask 1041409   ;;  %v159_v28 = vld [vmem:[%s619_s4] sm:$0xff] }
   0x5   :  { %416 = vmatpush3.bf16.msra.mxu0 %v415_v5  ;;  %v41_v14 = vrot.slane %v40_v12, 4  ;;  %v48_v15 = vrot.slane %v47_v13, 4  ;;  %vm473_vm3 = vmmov 0   ;;  %v160_v29 = vld [vmem:[%s619_s4 + $0x8] sm:$0xff]  ;;  %v161_v30 = vld [vmem:[%s619_s4 + $0x10] sm:$0xff]  ;;  %v162_v32 = vld [vmem:[%s619_s4 + $0x18] sm:$0xff] }
   0x6   :  { %417 = vmatprep.subr.bf16.mxu0 %v471_v4  ;;  %381 = vmatprep.mubr.msk.f32.mxu0 %vm473_vm3, %v472_v9  ;;  %v421_v31 = vpack.c.bf16 %v160_v29, %v159_v28  ;;  %v424_v35 = vpack.c.bf16 %v162_v32, %v161_v30  ;;  %v163_v36 = vld [vmem:[%s619_s4 + $0x20] sm:$0xff]  ;;  %v164_v37 = vld [vmem:[%s619_s4 + $0x28] sm:$0xff]  ;;  %v165_v42 = vld [vmem:[%s619_s4 + $0x30] sm:$0xff]  ;;  %vm174_vm4 = vcmask 523264   ;;  %s474_s19 = smov [#allocation3]  }
   0x7   :  { %v42_v16 = vadd.f32 %v41_v14, %v40_v12  ;;  %v49_v17 = vadd.f32 %v48_v15, %v47_v13  ;;  %400 = vmatprep.mubr.msk.f32.mxu1 %vm473_vm3, %v472_v9  ;;  %v427_v38 = vpack.c.bf16 %v164_v37, %v163_v36  ;;  %v166_v43 = vld [vmem:[%s619_s4 + $0x38] sm:$0xff]  ;;  %v249_v45 = vld [vmem:[%s621_s6] sm:$0xff]  ;;  %v250_v46 = vld [vmem:[%s621_s6 + $0x8] sm:$0xff]  ;;  %s340_s20 = sshll.u32 %s474_s19, 4  ;;  %s341_s20 = int_to_ptr.vmem [resolvable:$true] %s340_s20 }
   0x8   :  { %v38_v25 = vld [vmem:[#allocation2] sm:$0x3]  ;;  %422 = vmatpush3.bf16.msra.mxu1 %v421_v31  ;;  %v430_v44 = vpack.c.bf16 %v166_v43, %v165_v42  ;;  %v433_v47 = vpack.c.bf16 %v250_v46, %v249_v45  ;;  %v251_v53 = vld [vmem:[%s621_s6 + $0x10] sm:$0xff]  ;;  %v252_v54 = vld [vmem:[%s621_s6 + $0x18] sm:$0xff]  ;;  %s446_s6 = scalar_lea.vmem %s341_s20, 32  ;;  %p451_p1 = scmp.lt.s32.totalorder %s341_s20, %s341_s20 }
   0x9   :  { %419 = vmatpush3.bf16.msra.mxu0 %v418_v11  ;;  %v43_v18 = vrot.slane %v42_v16, 2  ;;  %v50_v19 = vrot.slane %v49_v17, 2  ;;  %423 = vmatprep.subr.bf16.mxu1 %v471_v4  ;;  %v348_v48 = vld [vmem:[%s618_s3] ss:$0 sm:$0xff]  ;;  %v436_v55 = vpack.c.bf16 %v252_v54, %v251_v53  ;;  %p447_p0 = scmp.ne.s32.totalorder %s341_s20, %s446_s6  ;;  %p452_p2 = scmp.lt.s32.totalorder %s446_s6, %s446_s6 }
   0xa   :  { %432 = vmatprep.subr.bf16.mxu0 %v471_v4  ;;  %v350_v56 = vld [vmem:[%s620_s5] ss:$0 sm:$0xff] }
   0xb   :  { %v44_v20 = vadd.f32 %v43_v18, %v42_v16  ;;  %v51_v21 = vadd.f32 %v50_v19, %v49_v17  ;;  %v352_v61 = vld [vmem:[%s622_s7] ss:$0 sm:$0xff]  ;;  %p453_p3 = por %p452_p2, %p451_p1 }
   0xc   :  { %v445_v22 = vpop.eup %444  ;;  %425 = vmatpush3.bf16.msra.mxu1 %v424_v35 }
   0xd   :  { %70 = vperm.xlu0 %443, %v445_v22   ;;  %v45_v23 = vrot.slane %v44_v20, 1  ;;  %v52_v24 = vrot.slane %v51_v21, 1  ;;  %426 = vmatprep.subr.bf16.mxu1 %v471_v4  ;;  %p454_p4 = pnand %p453_p3, %p447_p0 }
   0xf   :  { %v46_v26 = vadd.f32 %v45_v23, %v44_v20  ;;  %v53_v27 = vadd.f32 %v52_v24, %v51_v21 }
  0x10   :  { %428 = vmatpush3.bf16.msra.mxu1 %v427_v38 }
  0x11   :  { %v57_v33 = vsel %vm56_vm2, %v53_v27, %v46_v26  ;;  %429 = vmatprep.subr.bf16.mxu1 %v471_v4 }
  0x12   :  { %v59_v34 = vadd.f32 %v57_v33, %v38_v25 }
  0x14   :  { %61 = vst.msk [vmem:[#allocation2] sm:$0x3] %vm34_vm0, %v59_v34  ;;  %431 = vmatpush3.bf16.msra.mxu1 %v430_v44 }
  0x1b   :  { %v67_v39 = vld [vmem:[#allocation2] sm:$0x3] }
  0x8c   :  { %v71_v40 = vpop.permute.xlu0 %70 }
  0x8d   :  { %v73_v41 = vmul.f32 %v71_v40, %v67_v39 }
  0x8f   :  { %382 = vmatmul.mubr.msk.f32.vlgmr.msra.gmra.mrb[0].mxu0 %vm39_vm1, %v73_v41 }
  0x90   :  { %411 = vmatprep.mubr.msk.f32.mxu0 %vm473_vm3, %v472_v9  ;;  %434 = vmatpush3.bf16.msra.mxu0 %v433_v47 }
  0x91   :  { %435 = vmatprep.subr.bf16.mxu0 %v471_v4 }
  0x94   :  { %437 = vmatpush3.bf16.msra.mxu0 %v436_v55 }
 0x162   :  { %v154_v49 = vpop.f32.mrb[0].mxu0 }
 0x163   :  { %v155_v50 = vadd.f32 %v348_v48, %v154_v49  ;;  %v383_v51 = vpop.f32.mrb[1].mxu0 }
 0x165   :  { %v158_v52 = vmax.f32 %v155_v50, 0.0 }
 0x167   :  { %401 = vmatmul.mubr.msk.f32.vlgmr.msra.gmra.mrb[0].mxu1 %vm174_vm4, %v158_v52 }
 0x23a   :  { %v244_v57 = vpop.f32.mrb[0].mxu1 }
 0x23b   :  { %v245_v58 = vadd.f32 %v350_v56, %v244_v57  ;;  %v402_v59 = vpop.f32.mrb[1].mxu1 }
 0x23d   :  { %v248_v60 = vmax.f32 %v245_v58, 0.0 }
 0x23f   :  { %412 = vmatmul.mubr.msk.f32.vlgmr.msra.gmra.mrb[2].mxu0 %vm39_vm1, %v248_v60 }
 0x312   :  { %v329_v62 = vpop.f32.mrb[2].mxu0 }
 0x313   :  { %v330_v63 = vadd.f32 %v352_v61, %v329_v62  ;;  %v413_v0 = vpop.f32.mrb[3].mxu0 }
 0x315   :  { %333 = vst [vmem:[#allocation3] sm:$0x3] %v330_v63 }
 0x316   :  { %457 = shalt.err (!%p454_p4)
}
 0x317   :  { %s458_s22 = scalar_lea.hbm %s623_s8, 32 }
 0x318   :  { %p459_p5 = scmp.ne.s32.totalorder %s623_s8, %s458_s22  ;;  %p462_p6 = scmp.lt.u32.totalorder %s458_s22, %s623_s8 }
 0x31a   :  { %p464_p7 = pnand %p462_p6, %p459_p5 }
 0x31c   :  { %467 = shalt.err (!%p464_p7)
}
 0x31d   :  { %343 = dma.vmem_to_hbm [thread:$0]  %s341_s20, 32, %s623_s8, [#allocation4]  }
 0x31e   :  { %468 = dma.done.wait [#allocation4], 32  }
 0x31f   :  { %469 = vsyncadd [#allocation4], 4294967264 }
 0x320   :  { %347 = vsyncpa [#allocation4], 1 }

</bundles_post_ra>
